<compile_context>
chip_gen: v7x
topology: tpu7x:2x2x1
jax: 0.10.0
libtpu: 0.0.40
codegen_flags: <defaults>
</compile_context>

<pallas_src>
import functools

import jax
import jax.numpy as jnp
from jax.experimental import pallas as pl
from jax.experimental.pallas import tpu as pltpu

INPUT_SIZE = 256
NZ = 64


def _round_up(n, m):
    return ((n + m - 1) // m) * m


def _cdiv(a, b):
    return (a + b - 1) // b


def _generator_kernel(x_ref,
                      w1_ref, b1_ref,
                      w23_ref, b23_ref,
                      w4_ref, b4_ref,
                      o_ref):
    cdt = w1_ref.dtype                       # compute dtype (bf16 or f32)
    x = x_ref[...].astype(cdt)

    # encoder L1 + ReLU                         (f32 accumulation on the MXU)
    h = jnp.dot(x, w1_ref[...], preferred_element_type=jnp.float32) + b1_ref[...]
    h = jnp.maximum(h, 0.0).astype(cdt)

    # fused encoder-L2 @ decoder-L1 (single 256x256 matmul) + ReLU
    d = jnp.dot(h, w23_ref[...], preferred_element_type=jnp.float32) + b23_ref[...]
    d = jnp.maximum(d, 0.0).astype(cdt)

    # decoder L2 + Sigmoid (sigmoid in f32, exp on the EUP)
    y = jnp.dot(d, w4_ref[...], preferred_element_type=jnp.float32) + b4_ref[...]
    o_ref[...] = jax.nn.sigmoid(y).astype(o_ref.dtype)


@functools.partial(jax.jit,
                   static_argnames=("tile_m", "compute_dtype", "out_dtype"))
def generator_forward(x, params, *, tile_m=1024,
                      compute_dtype=jnp.bfloat16, out_dtype=jnp.float32):
    """x: [B, INPUT_SIZE] f32 -> [B, INPUT_SIZE] sigmoid output (out_dtype).

    tile_m:        requested batch-tile rows per grid step (auto-balanced).
    compute_dtype: MXU input dtype (bf16 default; f32 accumulation always).
    out_dtype:     output store dtype (f32 default; bf16 halves writeback).
    """
    B, D = x.shape
    assert D == INPUT_SIZE

    (w1, b1), (w2, b2), (w3, b3), (w4, b4) = params
    cdt = jnp.dtype(compute_dtype)

    # Fuse encoder-L2 and decoder-L1 (no nonlinearity between them), in f32.
    w23 = jnp.dot(w2, w3, preferred_element_type=jnp.float32)
    b23 = jnp.dot(b2, w3, preferred_element_type=jnp.float32) + b3

    w1c, w23c, w4c = (w.astype(cdt) for w in (w1, w23, w4))
    b1f, b23f, b4f = (b.astype(jnp.float32) for b in (b1, b23, b4))

    # --- balanced batch tiling -------------------------------------------
    # Pad only to a sublane multiple, then pick an 8-aligned tile that gives
    # (nearly) equal grid steps; force grid >= 2 when possible (v7x 2 TCs).
    B8 = _round_up(B, 8)
    tm_req = _round_up(max(8, min(int(tile_m), B8)), 8)
    grid_n = _cdiv(B8, tm_req)
    if grid_n == 1 and B8 >= 16:
        grid_n = 2
    tm = _round_up(_cdiv(B8, grid_n), 8)
    B_pad = tm * grid_n
    if B_pad != B:
        x = jnp.pad(x, ((0, B_pad - B), (0, 0)))

    def full_spec(shape):
        # Full-array resident block (constant index map -> no per-step re-DMA).
        return pl.BlockSpec(shape, lambda i: (0, 0))

    # --- VMEM budget -------------------------------------------------------
    in_tile = tm * INPUT_SIZE * x.dtype.itemsize
    out_tile = tm * INPUT_SIZE * jnp.dtype(out_dtype).itemsize
    weight_bytes = sum(int(a.size) * a.dtype.itemsize
                       for a in (w1c, b1f, w23c, b23f, w4c, b4f))
    act_bytes = 8 * tm * INPUT_SIZE * 4        # f32 + bf16 h/d/y intermediates
    vmem_limit = int(min(40 * 1024 * 1024,
                         max(16 * 1024 * 1024,
                             2 * (in_tile + out_tile) + 2 * weight_bytes
                             + act_bytes + (2 << 20))))

    out = pl.pallas_call(
        _generator_kernel,
        out_shape=jax.ShapeDtypeStruct((B_pad, INPUT_SIZE), out_dtype),
        grid_spec=pltpu.PrefetchScalarGridSpec(
            num_scalar_prefetch=0,
            grid=(grid_n,),
            in_specs=[
                pl.BlockSpec((tm, INPUT_SIZE), lambda i: (i, 0)),   # x tile
                full_spec(w1c.shape), full_spec(b1f.shape),         # enc L1
                full_spec(w23c.shape), full_spec(b23f.shape),       # fused mid
                full_spec(w4c.shape), full_spec(b4f.shape),         # dec L2
            ],
            out_specs=pl.BlockSpec((tm, INPUT_SIZE), lambda i: (i, 0)),
        ),
        compiler_params=pltpu.CompilerParams(
            dimension_semantics=("parallel",),     # megacore-shard batch tiles
            vmem_limit_bytes=vmem_limit,
        ),
    )(x, w1c, b1f, w23c, b23f, w4c, b4f)

    return out[:B] if B_pad != B else out


def init_params(key):
    """PyTorch nn.Linear-style init (U[-1/sqrt(in), 1/sqrt(in)]).

    Weights stored as [in_features, out_features] (transposed vs. PyTorch);
    biases as [1, out_features] for 2-D broadcasting inside the kernel."""
    def linear(key, fan_in, fan_out):
        kw, kb = jax.random.split(key)
        bound = 1.0 / jnp.sqrt(jnp.float32(fan_in))
        w = jax.random.uniform(kw, (fan_in, fan_out), jnp.float32, -bound, bound)
        b = jax.random.uniform(kb, (1, fan_out), jnp.float32, -bound, bound)
        return w, b

    k1, k2, k3, k4 = jax.random.split(key, 4)
    return (
        linear(k1, INPUT_SIZE, INPUT_SIZE),  # encoder Linear(256, 256)
        linear(k2, INPUT_SIZE, NZ),          # encoder Linear(256, 64)
        linear(k3, NZ, INPUT_SIZE),          # decoder Linear(64, 256)
        linear(k4, INPUT_SIZE, INPUT_SIZE),  # decoder Linear(256, 256)
    )


def _reference_forward(x, params):
    (w1, b1), (w2, b2), (w3, b3), (w4, b4) = params
    h = jnp.maximum(x @ w1 + b1, 0.0)
    z = h @ w2 + b2
    d = jnp.maximum(z @ w3 + b3, 0.0)
    return jax.nn.sigmoid(d @ w4 + b4)


if __name__ == "__main__":
    key = jax.random.PRNGKey(0)
    kx, kp = jax.random.split(key)
    params = init_params(kp)

    # 1) small batch, f32 compute path (fusion changes accumulation order,
    #    so the tolerance is slightly looser than exact f32).
    x_small = jax.random.normal(kx, (8, INPUT_SIZE), jnp.float32)
    out_f32 = jax.block_until_ready(
        generator_forward(x_small, params, tile_m=1024,
                          compute_dtype=jnp.float32))
    ref_f32 = _reference_forward(x_small, params)
    assert out_f32.shape == (8, INPUT_SIZE)
    assert jnp.allclose(out_f32, ref_f32, atol=5e-4, rtol=1e-4)

    # 2) ragged batch with the default bf16 MXU path (f32 accumulation);
    #    exercises minimal-padding + balanced 2-step grid (grid >= 2 for v7x).
    x_big = jax.random.normal(kx, (300, INPUT_SIZE), jnp.float32)
    out_bf16 = jax.block_until_ready(
        generator_forward(x_big, params, tile_m=1024,
                          compute_dtype=jnp.bfloat16))
    ref_big = _reference_forward(x_big, params)
    assert out_bf16.shape == (300, INPUT_SIZE)
    assert float(jnp.max(jnp.abs(out_bf16 - ref_big))) < 5e-2

    print("KERNEL_OK")
</pallas_src>

<mosaic_0001>
module attributes {stable_mosaic.version = 11 : i64} {
  func.func @_generator_kernel(%arg0: i32, %arg1: memref<8x256xf32, #tpu.memory_space<vmem>>, %arg2: memref<256x256xf32, #tpu.memory_space<vmem>>, %arg3: memref<1x256xf32, #tpu.memory_space<vmem>>, %arg4: memref<256x256xf32, #tpu.memory_space<vmem>>, %arg5: memref<1x256xf32, #tpu.memory_space<vmem>>, %arg6: memref<256x256xf32, #tpu.memory_space<vmem>>, %arg7: memref<1x256xf32, #tpu.memory_space<vmem>>, %arg8: memref<8x256xf32, #tpu.memory_space<vmem>>) attributes {dimension_semantics = [#tpu.dimension_semantics<parallel>], iteration_bounds = array<i64: 1>, scalar_prefetch = 0 : i64, scratch_operands = 0 : i64, tpu.core_type = #tpu.core_type<tc>, window_params = [{transform_indices = @transform_0, window_bounds = array<i64: 8, 256>}, {pipeline_mode = #tpu.pipeline_mode<synchronous>, transform_indices = @transform_1, window_bounds = array<i64: 256, 256>}, {pipeline_mode = #tpu.pipeline_mode<synchronous>, transform_indices = @transform_2, window_bounds = array<i64: 1, 256>}, {pipeline_mode = #tpu.pipeline_mode<synchronous>, transform_indices = @transform_3, window_bounds = array<i64: 256, 256>}, {pipeline_mode = #tpu.pipeline_mode<synchronous>, transform_indices = @transform_4, window_bounds = array<i64: 1, 256>}, {pipeline_mode = #tpu.pipeline_mode<synchronous>, transform_indices = @transform_5, window_bounds = array<i64: 256, 256>}, {pipeline_mode = #tpu.pipeline_mode<synchronous>, transform_indices = @transform_6, window_bounds = array<i64: 1, 256>}, {transform_indices = @transform_7, window_bounds = array<i64: 8, 256>}]} {
    %c0 = arith.constant 0 : index
    %c0_0 = arith.constant 0 : index
    %0 = vector.load %arg1[%c0, %c0_0] : memref<8x256xf32, #tpu.memory_space<vmem>>, vector<8x256xf32>
    %c0_1 = arith.constant 0 : index
    %c0_2 = arith.constant 0 : index
    %1 = vector.load %arg2[%c0_1, %c0_2] : memref<256x256xf32, #tpu.memory_space<vmem>>, vector<256x256xf32>
    %cst = arith.constant dense<0.000000e+00> : vector<8x256xf32>
    %2 = tpu.matmul %0, %1, %cst {dimension_numbers = #tpu.dot_dimension_numbers<[1], [0], [0], [1], [0, 0, 1, 1], [], []>} : vector<8x256xf32>, vector<256x256xf32>, vector<8x256xf32> -> vector<8x256xf32>
    %c0_3 = arith.constant 0 : index
    %c0_4 = arith.constant 0 : index
    %3 = vector.load %arg3[%c0_3, %c0_4] : memref<1x256xf32, #tpu.memory_space<vmem>>, vector<1x256xf32>
    %4 = vector.broadcast %3 : vector<1x256xf32> to vector<8x256xf32>
    %5 = arith.addf %2, %4 : vector<8x256xf32>
    %cst_5 = arith.constant 0.000000e+00 : f32
    %6 = vector.broadcast %cst_5 : f32 to vector<8x256xf32>
    %7 = arith.maximumf %5, %6 : vector<8x256xf32>
    %c0_6 = arith.constant 0 : index
    %c0_7 = arith.constant 0 : index
    %8 = vector.load %arg4[%c0_6, %c0_7] : memref<256x256xf32, #tpu.memory_space<vmem>>, vector<256x256xf32>
    %cst_8 = arith.constant dense<0.000000e+00> : vector<8x256xf32>
    %9 = tpu.matmul %7, %8, %cst_8 {dimension_numbers = #tpu.dot_dimension_numbers<[1], [0], [0], [1], [0, 0, 1, 1], [], []>} : vector<8x256xf32>, vector<256x256xf32>, vector<8x256xf32> -> vector<8x256xf32>
    %c0_9 = arith.constant 0 : index
    %c0_10 = arith.constant 0 : index
    %10 = vector.load %arg5[%c0_9, %c0_10] : memref<1x256xf32, #tpu.memory_space<vmem>>, vector<1x256xf32>
    %11 = vector.broadcast %10 : vector<1x256xf32> to vector<8x256xf32>
    %12 = arith.addf %9, %11 : vector<8x256xf32>
    %cst_11 = arith.constant 0.000000e+00 : f32
    %13 = vector.broadcast %cst_11 : f32 to vector<8x256xf32>
    %14 = arith.maximumf %12, %13 : vector<8x256xf32>
    %c0_12 = arith.constant 0 : index
    %c0_13 = arith.constant 0 : index
    %15 = vector.load %arg6[%c0_12, %c0_13] : memref<256x256xf32, #tpu.memory_space<vmem>>, vector<256x256xf32>
    %cst_14 = arith.constant dense<0.000000e+00> : vector<8x256xf32>
    %16 = tpu.matmul %14, %15, %cst_14 {dimension_numbers = #tpu.dot_dimension_numbers<[1], [0], [0], [1], [0, 0, 1, 1], [], []>} : vector<8x256xf32>, vector<256x256xf32>, vector<8x256xf32> -> vector<8x256xf32>
    %c0_15 = arith.constant 0 : index
    %c0_16 = arith.constant 0 : index
    %17 = vector.load %arg7[%c0_15, %c0_16] : memref<1x256xf32, #tpu.memory_space<vmem>>, vector<1x256xf32>
    %18 = vector.broadcast %17 : vector<1x256xf32> to vector<8x256xf32>
    %19 = arith.addf %16, %18 : vector<8x256xf32>
    %20 = arith.negf %19 : vector<8x256xf32>
    %21 = math.exp %20 : vector<8x256xf32>
    %cst_17 = arith.constant 1.000000e+00 : f32
    %22 = vector.broadcast %cst_17 : f32 to vector<8x256xf32>
    %23 = arith.addf %22, %21 : vector<8x256xf32>
    %24 = arith.divf %22, %23 : vector<8x256xf32>
    %c0_18 = arith.constant 0 : index
    %c0_19 = arith.constant 0 : index
    %25 = vector.load %arg8[%c0_18, %c0_19] : memref<8x256xf32, #tpu.memory_space<vmem>>, vector<8x256xf32>
    tpu.vector_store %arg8[%c0_18, %c0_19], %24 {strides = array<i32>} : memref<8x256xf32, #tpu.memory_space<vmem>>, vector<8x256xf32>,
    return
  }
  func.func @transform_0(%arg0: i32) -> (i32, i32) {
    %c0_i32 = arith.constant 0 : i32
    %c0_i32_0 = arith.constant 0 : i32
    return %arg0, %c0_i32 : i32, i32
  }
  func.func @transform_1(%arg0: i32) -> (i32, i32) {
    %c0_i32 = arith.constant 0 : i32
    %c0_i32_0 = arith.constant 0 : i32
    %c0_i32_1 = arith.constant 0 : i32
    return %c0_i32, %c0_i32_0 : i32, i32
  }
  func.func @transform_2(%arg0: i32) -> (i32, i32) {
    %c0_i32 = arith.constant 0 : i32
    %c0_i32_0 = arith.constant 0 : i32
    %c0_i32_1 = arith.constant 0 : i32
    return %c0_i32, %c0_i32_0 : i32, i32
  }
  func.func @transform_3(%arg0: i32) -> (i32, i32) {
    %c0_i32 = arith.constant 0 : i32
    %c0_i32_0 = arith.constant 0 : i32
    %c0_i32_1 = arith.constant 0 : i32
    return %c0_i32, %c0_i32_0 : i32, i32
  }
  func.func @transform_4(%arg0: i32) -> (i32, i32) {
    %c0_i32 = arith.constant 0 : i32
    %c0_i32_0 = arith.constant 0 : i32
    %c0_i32_1 = arith.constant 0 : i32
    return %c0_i32, %c0_i32_0 : i32, i32
  }
  func.func @transform_5(%arg0: i32) -> (i32, i32) {
    %c0_i32 = arith.constant 0 : i32
    %c0_i32_0 = arith.constant 0 : i32
    %c0_i32_1 = arith.constant 0 : i32
    return %c0_i32, %c0_i32_0 : i32, i32
  }
  func.func @transform_6(%arg0: i32) -> (i32, i32) {
    %c0_i32 = arith.constant 0 : i32
    %c0_i32_0 = arith.constant 0 : i32
    %c0_i32_1 = arith.constant 0 : i32
    return %c0_i32, %c0_i32_0 : i32, i32
  }
  func.func @transform_7(%arg0: i32) -> (i32, i32) {
    %c0_i32 = arith.constant 0 : i32
    %c0_i32_0 = arith.constant 0 : i32
    return %arg0, %c0_i32 : i32, i32
  }
}

</mosaic_0001>

<bundles_post_ra>
// kernel: generator_forward.1
= control target key start
LH: loop header
LB: loop body
LE: loop exit
PB: predicated region body
PF: predicated region fallthrough
CT: control target
= control target key end

     0   :  { %12 = vsyncpa [#allocation3], 0  ;;  %s1238_s0 = inlined_call_operand.vmem [shape: f32[8,256], index: 0, kind: input, shape index: {}]   ;;  %s1239_s1 = inlined_call_operand.vmem [shape: f32[256,256], index: 1, kind: input, shape index: {}]   ;;  %s1240_s2 = inlined_call_operand.vmem [shape: f32[1,256], index: 2, kind: input, shape index: {}]   ;;  %s1241_s3 = inlined_call_operand.vmem [shape: f32[256,256], index: 3, kind: input, shape index: {}]   ;;  %s1242_s4 = inlined_call_operand.vmem [shape: f32[1,256], index: 4, kind: input, shape index: {}]   ;;  %s1243_s5 = inlined_call_operand.hbm [shape: f32[256,256], index: 5, kind: input, shape index: {}]   ;;  %s1244_s6 = inlined_call_operand.vmem [shape: f32[1,256], index: 6, kind: input, shape index: {}]   ;;  %s1245_s7 = inlined_call_operand.hbm [shape: f32[8,256], index: 7, kind: output, shape index: {}]  }
   0x1   :  { %13 = vsyncpa [#allocation4], 0  ;;  %s771_s24 = smov [#allocation2]   ;;  %s723_s28 = scalar_lea.hbm %s1243_s5, 8192 }
   0x2   :  { %s29_s25 = sshll.u32 %s771_s24, 4  ;;  %p724_p0 = scmp.ne.s32.totalorder %s1243_s5, %s723_s28  ;;  %s30_s25 = int_to_ptr.vmem [resolvable:$true] %s29_s25 }
   0x3   :  { %p727_p1 = scmp.lt.u32.totalorder %s723_s28, %s1243_s5 }
   0x5   :  { %p729_p2 = pnand %p727_p1, %p724_p0 }
   0x7   :  { %732 = shalt.err (!%p729_p2)
}
   0x8   :  { %s733_s10 = scalar_lea.vmem %s30_s25, 8192  ;;  %p738_p4 = scmp.lt.s32.totalorder %s30_s25, %s30_s25 }
   0x9   :  { %p734_p3 = scmp.ne.s32.totalorder %s30_s25, %s733_s10  ;;  %p739_p5 = scmp.lt.s32.totalorder %s733_s10, %s733_s10 }
   0xb   :  { %p740_p6 = por %p739_p5, %p738_p4 }
   0xd   :  { %p741_p7 = pnand %p740_p6, %p734_p3 }
   0xf   :  { %744 = shalt.err (!%p741_p7)
}
  0x10   :  { %s772_s11 = smov 256   ;;  %s773_s12 = smov 16  }
  0x11   :  { %35 = dma.hbm_to_vmem [thread:$0]  %s1243_s5, 8192, %s30_s25, [#allocation3], %s772_s11, %s772_s11, %s773_s12  }
  0x12   :  { %767 = dma.done.wait [#allocation3], 8192  }
  0x13   :  { %768 = vsyncadd [#allocation3], 4294959104  ;;  %v44_v0 = vld [vmem:[%s1239_s1 + $0x8] sm:$0xff]  ;;  %v46_v1 = vld [vmem:[%s1239_s1 + $0x18] sm:$0xff] }
  0x14   :  { %v43_v2 = vld [vmem:[%s1239_s1] sm:$0xff]  ;;  %v519_v3 = vpack.c.bf16 %v46_v1, %v44_v0  ;;  %v45_v4 = vld [vmem:[%s1239_s1 + $0x10] sm:$0xff]  ;;  %v48_v5 = vld [vmem:[%s1239_s1 + $0x28] sm:$0xff] }
  0x15   :  { %v50_v6 = vld [vmem:[%s1239_s1 + $0x38] sm:$0xff]  ;;  %v521_v7 = vpack.c.bf16 %v45_v4, %v43_v2  ;;  %v47_v9 = vld [vmem:[%s1239_s1 + $0x20] sm:$0xff]  ;;  %v49_v10 = vld [vmem:[%s1239_s1 + $0x30] sm:$0xff] }
  0x16   :  { %v523_v8 = vpack.c.bf16 %v50_v6, %v48_v5  ;;  %v52_v11 = vld [vmem:[%s1239_s1 + $0x48] sm:$0xff]  ;;  %520 = vmatprep.subr.bf16.mxu0 %v519_v3  ;;  %v54_v12 = vld [vmem:[%s1239_s1 + $0x58] sm:$0xff]  ;;  %v525_v13 = vpack.c.bf16 %v49_v10, %v47_v9  ;;  %v51_v15 = vld [vmem:[%s1239_s1 + $0x40] sm:$0xff] }
  0x17   :  { %522 = vmatpush1.bf16.msra.mxu0 %v521_v7  ;;  %v527_v14 = vpack.c.bf16 %v54_v12, %v52_v11  ;;  %v53_v16 = vld [vmem:[%s1239_s1 + $0x50] sm:$0xff]  ;;  %v56_v17 = vld [vmem:[%s1239_s1 + $0x68] sm:$0xff]  ;;  %v58_v18 = vld [vmem:[%s1239_s1 + $0x78] sm:$0xff] }
  0x18   :  { %524 = vmatprep.subr.bf16.mxu0 %v523_v8  ;;  %v529_v19 = vpack.c.bf16 %v53_v16, %v51_v15  ;;  %v531_v20 = vpack.c.bf16 %v58_v18, %v56_v17  ;;  %v55_v21 = vld [vmem:[%s1239_s1 + $0x60] sm:$0xff]  ;;  %v57_v22 = vld [vmem:[%s1239_s1 + $0x70] sm:$0xff]  ;;  %v60_v23 = vld [vmem:[%s1239_s1 + $0x88] sm:$0xff] }
  0x19   :  { %v62_v24 = vld [vmem:[%s1239_s1 + $0x98] sm:$0xff]  ;;  %v533_v25 = vpack.c.bf16 %v57_v22, %v55_v21  ;;  %v59_v27 = vld [vmem:[%s1239_s1 + $0x80] sm:$0xff]  ;;  %v61_v28 = vld [vmem:[%s1239_s1 + $0x90] sm:$0xff] }
  0x1a   :  { %v535_v26 = vpack.c.bf16 %v62_v24, %v60_v23  ;;  %v64_v29 = vld [vmem:[%s1239_s1 + $0xa8] sm:$0xff]  ;;  %v66_v30 = vld [vmem:[%s1239_s1 + $0xb8] sm:$0xff]  ;;  %v537_v31 = vpack.c.bf16 %v61_v28, %v59_v27  ;;  %v63_v33 = vld [vmem:[%s1239_s1 + $0xa0] sm:$0xff] }
  0x1b   :  { %526 = vmatpush1.bf16.msra.mxu0 %v525_v13  ;;  %v539_v32 = vpack.c.bf16 %v66_v30, %v64_v29  ;;  %v65_v34 = vld [vmem:[%s1239_s1 + $0xb0] sm:$0xff]  ;;  %v68_v35 = vld [vmem:[%s1239_s1 + $0xc8] sm:$0xff]  ;;  %v70_v36 = vld [vmem:[%s1239_s1 + $0xd8] sm:$0xff] }
  0x1c   :  { %528 = vmatprep.subr.bf16.mxu0 %v527_v14  ;;  %v541_v37 = vpack.c.bf16 %v65_v34, %v63_v33  ;;  %v67_v38 = vld [vmem:[%s1239_s1 + $0xc0] sm:$0xff]  ;;  %v69_v39 = vld [vmem:[%s1239_s1 + $0xd0] sm:$0xff]  ;;  %v543_v40 = vpack.c.bf16 %v70_v36, %v68_v35  ;;  %v72_v41 = vld [vmem:[%s1239_s1 + $0xe8] sm:$0xff] }
  0x1d   :  { %v74_v42 = vld [vmem:[%s1239_s1 + $0xf8] sm:$0xff]  ;;  %v42_v43 = vld [vmem:[%s1238_s0 + $0x8] sm:$0xff]  ;;  %v192_v46 = vld [vmem:[%s1241_s3] sm:$0xff]  ;;  %v545_v51 = vpack.c.bf16 %v69_v39, %v67_v38 }
  0x1e   :  { %183 = vmatprep.mubr.f32.mxu0 %v42_v43  ;;  %v193_v44 = vld [vmem:[%s1241_s3 + $0x8] sm:$0xff]  ;;  %v195_v45 = vld [vmem:[%s1241_s3 + $0x18] sm:$0xff]  ;;  %v194_v48 = vld [vmem:[%s1241_s3 + $0x10] sm:$0xff]  ;;  %v547_v57 = vpack.c.bf16 %v74_v42, %v72_v41 }
  0x1f   :  { %530 = vmatpush1.bf16.msra.mxu0 %v529_v19  ;;  %v583_v47 = vpack.c.bf16 %v195_v45, %v193_v44  ;;  %v197_v49 = vld [vmem:[%s1241_s3 + $0x28] sm:$0xff]  ;;  %v199_v50 = vld [vmem:[%s1241_s3 + $0x38] sm:$0xff]  ;;  %v585_v52 = vpack.c.bf16 %v194_v48, %v192_v46  ;;  %v196_v54 = vld [vmem:[%s1241_s3 + $0x20] sm:$0xff] }
  0x20   :  { %532 = vmatprep.subr.bf16.mxu0 %v531_v20  ;;  %v587_v53 = vpack.c.bf16 %v199_v50, %v197_v49  ;;  %v198_v55 = vld [vmem:[%s1241_s3 + $0x30] sm:$0xff]  ;;  %v201_v56 = vld [vmem:[%s1241_s3 + $0x48] sm:$0xff]  ;;  %v71_v58 = vld [vmem:[%s1239_s1 + $0xe0] sm:$0xff] }
  0x21   :  { %v73_v59 = vld [vmem:[%s1239_s1 + $0xf0] sm:$0xff]  ;;  %584 = vmatprep.subr.bf16.mxu1 %v583_v47  ;;  %v203_v60 = vld [vmem:[%s1241_s3 + $0x58] sm:$0xff]  ;;  %v76_v61 = vld [vmem:[%s1239_s1 + $0x108] sm:$0xff]  ;;  %v589_v63 = vpack.c.bf16 %v198_v55, %v196_v54 }
  0x22   :  { %v78_v62 = vld [vmem:[%s1239_s1 + $0x118] sm:$0xff]  ;;  %586 = vmatpush1.bf16.msra.mxu1 %v585_v52  ;;  %v591_v0 = vpack.c.bf16 %v203_v60, %v201_v56  ;;  %v200_v1 = vld [vmem:[%s1241_s3 + $0x40] sm:$0xff]  ;;  %v202_v2 = vld [vmem:[%s1241_s3 + $0x50] sm:$0xff]  ;;  %v549_v3 = vpack.c.bf16 %v73_v59, %v71_v58 }
  0x23   :  { %534 = vmatpush1.bf16.msra.mxu0 %v533_v25  ;;  %588 = vmatprep.subr.bf16.mxu1 %v587_v53  ;;  %v205_v4 = vld [vmem:[%s1241_s3 + $0x68] sm:$0xff]  ;;  %v207_v5 = vld [vmem:[%s1241_s3 + $0x78] sm:$0xff]  ;;  %v551_v6 = vpack.c.bf16 %v78_v62, %v76_v61  ;;  %v75_v7 = vld [vmem:[%s1239_s1 + $0x100] sm:$0xff]  ;;  %v593_v11 = vpack.c.bf16 %v202_v2, %v200_v1 }
  0x24   :  { %536 = vmatprep.subr.bf16.mxu0 %v535_v26  ;;  %v77_v8 = vld [vmem:[%s1239_s1 + $0x110] sm:$0xff]  ;;  %v80_v9 = vld [vmem:[%s1239_s1 + $0x128] sm:$0xff]  ;;  %v82_v10 = vld [vmem:[%s1239_s1 + $0x138] sm:$0xff]  ;;  %v595_v12 = vpack.c.bf16 %v207_v5, %v205_v4 }
  0x25   :  { %v204_v13 = vld [vmem:[%s1241_s3 + $0x60] sm:$0xff]  ;;  %v206_v14 = vld [vmem:[%s1241_s3 + $0x70] sm:$0xff]  ;;  %v553_v15 = vpack.c.bf16 %v77_v8, %v75_v7  ;;  %v209_v16 = vld [vmem:[%s1241_s3 + $0x88] sm:$0xff]  ;;  %v555_v18 = vpack.c.bf16 %v82_v10, %v80_v9 }
  0x26   :  { %590 = vmatpush1.bf16.msra.mxu1 %v589_v63  ;;  %v211_v17 = vld [vmem:[%s1241_s3 + $0x98] sm:$0xff]  ;;  %v79_v19 = vld [vmem:[%s1239_s1 + $0x120] sm:$0xff]  ;;  %v81_v20 = vld [vmem:[%s1239_s1 + $0x130] sm:$0xff]  ;;  %v597_v23 = vpack.c.bf16 %v206_v14, %v204_v13 }
  0x27   :  { %538 = vmatpush1.bf16.msra.mxu0 %v537_v31  ;;  %592 = vmatprep.subr.bf16.mxu1 %v591_v0  ;;  %v84_v21 = vld [vmem:[%s1239_s1 + $0x148] sm:$0xff]  ;;  %v86_v22 = vld [vmem:[%s1239_s1 + $0x158] sm:$0xff]  ;;  %v599_v24 = vpack.c.bf16 %v211_v17, %v209_v16  ;;  %v208_v25 = vld [vmem:[%s1241_s3 + $0x80] sm:$0xff]  ;;  %v557_v27 = vpack.c.bf16 %v81_v20, %v79_v19 }
  0x28   :  { %540 = vmatprep.subr.bf16.mxu0 %v539_v32  ;;  %v210_v26 = vld [vmem:[%s1241_s3 + $0x90] sm:$0xff]  ;;  %v213_v28 = vld [vmem:[%s1241_s3 + $0xa8] sm:$0xff]  ;;  %v215_v29 = vld [vmem:[%s1241_s3 + $0xb8] sm:$0xff]  ;;  %v559_v30 = vpack.c.bf16 %v86_v22, %v84_v21 }
  0x29   :  { %v83_v31 = vld [vmem:[%s1239_s1 + $0x140] sm:$0xff]  ;;  %v85_v32 = vld [vmem:[%s1239_s1 + $0x150] sm:$0xff]  ;;  %v88_v33 = vld [vmem:[%s1239_s1 + $0x168] sm:$0xff]  ;;  %v601_v35 = vpack.c.bf16 %v210_v26, %v208_v25  ;;  %v603_v36 = vpack.c.bf16 %v215_v29, %v213_v28 }
  0x2a   :  { %594 = vmatpush1.bf16.msra.mxu1 %v593_v11  ;;  %v90_v34 = vld [vmem:[%s1239_s1 + $0x178] sm:$0xff]  ;;  %v214_v38 = vld [vmem:[%s1241_s3 + $0xb0] sm:$0xff]  ;;  %v561_v39 = vpack.c.bf16 %v85_v32, %v83_v31  ;;  %v87_v43 = vld [vmem:[%s1239_s1 + $0x160] sm:$0xff] }
  0x2b   :  { %542 = vmatpush1.bf16.msra.mxu0 %v541_v37  ;;  %596 = vmatprep.subr.bf16.mxu1 %v595_v12  ;;  %v212_v37 = vld [vmem:[%s1241_s3 + $0xa0] sm:$0xff]  ;;  %v219_v41 = vld [vmem:[%s1241_s3 + $0xd8] sm:$0xff]  ;;  %v563_v42 = vpack.c.bf16 %v90_v34, %v88_v33  ;;  %v89_v44 = vld [vmem:[%s1239_s1 + $0x170] sm:$0xff] }
  0x2c   :  { %544 = vmatprep.subr.bf16.mxu0 %v543_v40  ;;  %v217_v40 = vld [vmem:[%s1241_s3 + $0xc8] sm:$0xff]  ;;  %v94_v46 = vld [vmem:[%s1239_s1 + $0x198] sm:$0xff]  ;;  %v605_v47 = vpack.c.bf16 %v214_v38, %v212_v37  ;;  %v216_v49 = vld [vmem:[%s1241_s3 + $0xc0] sm:$0xff] }
  0x2d   :  { %v92_v45 = vld [vmem:[%s1239_s1 + $0x188] sm:$0xff]  ;;  %v607_v48 = vpack.c.bf16 %v219_v41, %v217_v40  ;;  %v218_v50 = vld [vmem:[%s1241_s3 + $0xd0] sm:$0xff]  ;;  %v223_v53 = vld [vmem:[%s1241_s3 + $0xf8] sm:$0xff] }
  0x2e   :  { %598 = vmatpush1.bf16.msra.mxu1 %v597_v23  ;;  %v221_v52 = vld [vmem:[%s1241_s3 + $0xe8] sm:$0xff]  ;;  %v567_v54 = vpack.c.bf16 %v94_v46, %v92_v45  ;;  %v91_v55 = vld [vmem:[%s1239_s1 + $0x180] sm:$0xff]  ;;  %v93_v56 = vld [vmem:[%s1239_s1 + $0x190] sm:$0xff]  ;;  %v609_v59 = vpack.c.bf16 %v218_v50, %v216_v49 }
  0x2f   :  { %546 = vmatpush1.bf16.msra.mxu0 %v545_v51  ;;  %600 = vmatprep.subr.bf16.mxu1 %v599_v24  ;;  %v565_v51 = vpack.c.bf16 %v89_v44, %v87_v43  ;;  %v98_v58 = vld [vmem:[%s1239_s1 + $0x1b8] sm:$0xff]  ;;  %v611_v60 = vpack.c.bf16 %v223_v53, %v221_v52  ;;  %v220_v61 = vld [vmem:[%s1241_s3 + $0xe0] sm:$0xff]  ;;  %v222_v62 = vld [vmem:[%s1241_s3 + $0xf0] sm:$0xff]  ;;  %v569_v63 = vpack.c.bf16 %v93_v56, %v91_v55 }
  0x30   :  { %548 = vmatprep.subr.bf16.mxu0 %v547_v57  ;;  %v96_v57 = vld [vmem:[%s1239_s1 + $0x1a8] sm:$0xff]  ;;  %v227_v1 = vld [vmem:[%s1241_s3 + $0x118] sm:$0xff]  ;;  %v97_v4 = vld [vmem:[%s1239_s1 + $0x1b0] sm:$0xff]  ;;  %v613_v7 = vpack.c.bf16 %v222_v62, %v220_v61 }
  0x31   :  { %v225_v0 = vld [vmem:[%s1241_s3 + $0x108] sm:$0xff]  ;;  %v571_v2 = vpack.c.bf16 %v98_v58, %v96_v57  ;;  %v224_v9 = vld [vmem:[%s1241_s3 + $0x100] sm:$0xff]  ;;  %v226_v10 = vld [vmem:[%s1241_s3 + $0x110] sm:$0xff] }
  0x32   :  { %602 = vmatpush1.bf16.msra.mxu1 %v601_v35  ;;  %v100_v5 = vld [vmem:[%s1239_s1 + $0x1c8] sm:$0xff]  ;;  %v615_v8 = vpack.c.bf16 %v227_v1, %v225_v0  ;;  %v231_v13 = vld [vmem:[%s1241_s3 + $0x138] sm:$0xff]  ;;  %v101_v16 = vld [vmem:[%s1239_s1 + $0x1d0] sm:$0xff]  ;;  %v617_v19 = vpack.c.bf16 %v226_v10, %v224_v9 }
  0x33   :  { %550 = vmatpush1.bf16.msra.mxu0 %v549_v3  ;;  %604 = vmatprep.subr.bf16.mxu1 %v603_v36  ;;  %v95_v3 = vld [vmem:[%s1239_s1 + $0x1a0] sm:$0xff]  ;;  %v229_v12 = vld [vmem:[%s1241_s3 + $0x128] sm:$0xff]  ;;  %v230_v22 = vld [vmem:[%s1241_s3 + $0x130] sm:$0xff] }
  0x34   :  { %552 = vmatprep.subr.bf16.mxu0 %v551_v6  ;;  %v102_v6 = vld [vmem:[%s1239_s1 + $0x1d8] sm:$0xff]  ;;  %v573_v11 = vpack.c.bf16 %v97_v4, %v95_v3  ;;  %v104_v17 = vld [vmem:[%s1239_s1 + $0x1e8] sm:$0xff]  ;;  %v619_v20 = vpack.c.bf16 %v231_v13, %v229_v12  ;;  %v228_v21 = vld [vmem:[%s1241_s3 + $0x120] sm:$0xff] }
  0x35   :  { %v575_v14 = vpack.c.bf16 %v102_v6, %v100_v5  ;;  %v233_v24 = vld [vmem:[%s1241_s3 + $0x148] sm:$0xff]  ;;  %v235_v25 = vld [vmem:[%s1241_s3 + $0x158] sm:$0xff]  ;;  %v105_v28 = vld [vmem:[%s1239_s1 + $0x1f0] sm:$0xff]  ;;  %v621_v29 = vpack.c.bf16 %v230_v22, %v228_v21 }
  0x36   :  { %606 = vmatpush1.bf16.msra.mxu1 %v605_v47  ;;  %v232_v31 = vld [vmem:[%s1241_s3 + $0x140] sm:$0xff]  ;;  %v234_v32 = vld [vmem:[%s1241_s3 + $0x150] sm:$0xff]  ;;  %v237_v34 = vld [vmem:[%s1241_s3 + $0x168] sm:$0xff] }
  0x37   :  { %554 = vmatpush1.bf16.msra.mxu0 %v553_v15  ;;  %608 = vmatprep.subr.bf16.mxu1 %v607_v48  ;;  %v99_v15 = vld [vmem:[%s1239_s1 + $0x1c0] sm:$0xff]  ;;  %v239_v35 = vld [vmem:[%s1241_s3 + $0x178] sm:$0xff]  ;;  %v625_v36 = vpack.c.bf16 %v234_v32, %v232_v31  ;;  %v241_v41 = vld [vmem:[%s1241_s3 + $0x188] sm:$0xff] }
  0x38   :  { %556 = vmatprep.subr.bf16.mxu0 %v555_v18  ;;  %v106_v18 = vld [vmem:[%s1239_s1 + $0x1f8] sm:$0xff]  ;;  %v577_v23 = vpack.c.bf16 %v101_v16, %v99_v15  ;;  %v627_v37 = vpack.c.bf16 %v239_v35, %v237_v34  ;;  %v236_v38 = vld [vmem:[%s1241_s3 + $0x160] sm:$0xff]  ;;  %v242_v46 = vld [vmem:[%s1241_s3 + $0x190] sm:$0xff] }
  0x39   :  { %v579_v26 = vpack.c.bf16 %v106_v18, %v104_v17  ;;  %v41_v40 = vld [vmem:[%s1238_s0] sm:$0xff]  ;;  %v245_v47 = vld [vmem:[%s1241_s3 + $0x1a8] sm:$0xff]  ;;  %v247_v48 = vld [vmem:[%s1241_s3 + $0x1b8] sm:$0xff] }
  0x3a   :  { %610 = vmatpush1.bf16.msra.mxu1 %v609_v59  ;;  %v240_v45 = vld [vmem:[%s1241_s3 + $0x180] sm:$0xff]  ;;  %v635_v50 = vpack.c.bf16 %v247_v48, %v245_v47  ;;  %v246_v52 = vld [vmem:[%s1241_s3 + $0x1b0] sm:$0xff]  ;;  %v249_v53 = vld [vmem:[%s1241_s3 + $0x1c8] sm:$0xff] }
  0x3b   :  { %558 = vmatpush1.bf16.msra.mxu0 %v557_v27  ;;  %612 = vmatprep.subr.bf16.mxu1 %v611_v60  ;;  %v103_v27 = vld [vmem:[%s1239_s1 + $0x1e0] sm:$0xff]  ;;  %v633_v49 = vpack.c.bf16 %v242_v46, %v240_v45  ;;  %v250_v58 = vld [vmem:[%s1241_s3 + $0x1d0] sm:$0xff]  ;;  %v253_v60 = vld [vmem:[%s1241_s3 + $0x1e8] sm:$0xff] }
  0x3c   :  { %560 = vmatprep.subr.bf16.mxu0 %v559_v30  ;;  %v623_v30 = vpack.c.bf16 %v235_v25, %v233_v24  ;;  %v581_v33 = vpack.c.bf16 %v105_v28, %v103_v27  ;;  %v248_v57 = vld [vmem:[%s1241_s3 + $0x1c0] sm:$0xff]  ;;  %v255_v61 = vld [vmem:[%s1241_s3 + $0x1f8] sm:$0xff]  ;;  %v254_v0 = vld [vmem:[%s1241_s3 + $0x1f0] sm:$0xff] }
  0x3d   :  { %v641_v59 = vpack.c.bf16 %v250_v58, %v248_v57  ;;  %v643_v62 = vpack.c.bf16 %v255_v61, %v253_v60  ;;  %v344_v3 = vld [vmem:[#allocation2 + $0x18] sm:$0xff]  ;;  %v341_v4 = vld [vmem:[#allocation2] sm:$0xff]  ;;  %v343_v6 = vld [vmem:[#allocation2 + $0x10] sm:$0xff] }
  0x3e   :  { %614 = vmatpush1.bf16.msra.mxu1 %v613_v7  ;;  %v346_v7 = vld [vmem:[#allocation2 + $0x28] sm:$0xff]  ;;  %v649_v9 = vpack.c.bf16 %v343_v6, %v341_v4  ;;  %v347_v12 = vld [vmem:[#allocation2 + $0x30] sm:$0xff]  ;;  %v349_v17 = vld [vmem:[#allocation2 + $0x40] sm:$0xff] }
  0x3f   :  { %562 = vmatpush1.bf16.msra.mxu0 %v561_v39  ;;  %616 = vmatprep.subr.bf16.mxu1 %v615_v8  ;;  %v238_v39 = vld [vmem:[%s1241_s3 + $0x170] sm:$0xff]  ;;  %v348_v8 = vld [vmem:[#allocation2 + $0x38] sm:$0xff]  ;;  %v350_v13 = vld [vmem:[#allocation2 + $0x48] sm:$0xff] }
  0x40   :  { %564 = vmatprep.subr.bf16.mxu0 %v563_v42  ;;  %v243_v42 = vld [vmem:[%s1241_s3 + $0x198] sm:$0xff]  ;;  %v629_v43 = vpack.c.bf16 %v238_v39, %v236_v38  ;;  %v651_v10 = vpack.c.bf16 %v348_v8, %v346_v7  ;;  %v351_v18 = vld [vmem:[#allocation2 + $0x50] sm:$0xff]  ;;  %v358_v25 = vld [vmem:[#allocation2 + $0x88] sm:$0xff] }
  0x41   :  { %v631_v44 = vpack.c.bf16 %v243_v42, %v241_v41  ;;  %v657_v21 = vpack.c.bf16 %v351_v18, %v349_v17  ;;  %v355_v24 = vld [vmem:[#allocation2 + $0x70] sm:$0xff]  ;;  %v362_v31 = vld [vmem:[#allocation2 + $0xa8] sm:$0xff]  ;;  %v364_v32 = vld [vmem:[#allocation2 + $0xb8] sm:$0xff] }
  0x42   :  { %618 = vmatpush1.bf16.msra.mxu1 %v617_v19  ;;  %v354_v19 = vld [vmem:[#allocation2 + $0x68] sm:$0xff]  ;;  %v667_v34 = vpack.c.bf16 %v364_v32, %v362_v31  ;;  %v361_v35 = vld [vmem:[#allocation2 + $0xa0] sm:$0xff]  ;;  %v368_v38 = vld [vmem:[#allocation2 + $0xd8] sm:$0xff] }
  0x43   :  { %566 = vmatpush1.bf16.msra.mxu0 %v565_v51  ;;  %620 = vmatprep.subr.bf16.mxu1 %v619_v20  ;;  %v244_v51 = vld [vmem:[%s1241_s3 + $0x1a0] sm:$0xff]  ;;  %v356_v20 = vld [vmem:[#allocation2 + $0x78] sm:$0xff]  ;;  %v367_v42 = vld [vmem:[#allocation2 + $0xd0] sm:$0xff] }
  0x44   :  { %568 = vmatprep.subr.bf16.mxu0 %v567_v54  ;;  %v251_v54 = vld [vmem:[%s1241_s3 + $0x1d8] sm:$0xff]  ;;  %v637_v55 = vpack.c.bf16 %v246_v52, %v244_v51  ;;  %v659_v22 = vpack.c.bf16 %v356_v20, %v354_v19  ;;  %v365_v41 = vld [vmem:[#allocation2 + $0xc0] sm:$0xff]  ;;  %v371_v48 = vld [vmem:[#allocation2 + $0xf0] sm:$0xff] }
  0x45   :  { %v639_v56 = vpack.c.bf16 %v251_v54, %v249_v53  ;;  %v673_v45 = vpack.c.bf16 %v367_v42, %v365_v41  ;;  %v369_v47 = vld [vmem:[#allocation2 + $0xe0] sm:$0xff]  ;;  %v375_v54 = vld [vmem:[#allocation2 + $0x110] sm:$0xff]  ;;  %v382_v61 = vld [vmem:[#allocation2 + $0x148] sm:$0xff] }
  0x46   :  { %622 = vmatpush1.bf16.msra.mxu1 %v621_v29  ;;  %v357_v29 = vld [vmem:[#allocation2 + $0x80] sm:$0xff]  ;;  %v677_v51 = vpack.c.bf16 %v371_v48, %v369_v47  ;;  %v379_v60 = vld [vmem:[#allocation2 + $0x130] sm:$0xff]  ;;  %v388_v4 = vld [vmem:[#allocation2 + $0x178] sm:$0xff] }
  0x47   :  { %570 = vmatpush1.bf16.msra.mxu0 %v569_v63  ;;  %624 = vmatprep.subr.bf16.mxu1 %v623_v30  ;;  %v252_v63 = vld [vmem:[%s1241_s3 + $0x1e0] sm:$0xff]  ;;  %v359_v30 = vld [vmem:[#allocation2 + $0x90] sm:$0xff]  ;;  %v402_v41 = vld [vmem:[#allocation2 + $0x1e8] sm:$0xff] }
  0x48   :  { %572 = vmatprep.subr.bf16.mxu0 %v571_v2  ;;  %v645_v1 = vpack.c.bf16 %v254_v0, %v252_v63  ;;  %v342_v2 = vld [vmem:[#allocation2 + $0x8] sm:$0xff]  ;;  %v373_v53 = vld [vmem:[#allocation2 + $0x100] sm:$0xff]  ;;  %v387_v8 = vld [vmem:[#allocation2 + $0x170] sm:$0xff] }
  0x49   :  { %v647_v5 = vpack.c.bf16 %v344_v3, %v342_v2  ;;  %v681_v57 = vpack.c.bf16 %v375_v54, %v373_v53  ;;  %v383_v2 = vld [vmem:[#allocation2 + $0x150] sm:$0xff]  ;;  %v386_v3 = vld [vmem:[#allocation2 + $0x168] sm:$0xff]  ;;  %v385_v7 = vld [vmem:[#allocation2 + $0x160] sm:$0xff] }
  0x4a   :  { %626 = vmatpush1.bf16.msra.mxu1 %v625_v36  ;;  %v363_v36 = vld [vmem:[#allocation2 + $0xb0] sm:$0xff]  ;;  %v691_v6 = vpack.c.bf16 %v388_v4, %v386_v3  ;;  %v393_v19 = vld [vmem:[#allocation2 + $0x1a0] sm:$0xff]  ;;  %v404_v42 = vld [vmem:[#allocation2 + $0x1f8] sm:$0xff] }
  0x4b   :  { %574 = vmatpush1.bf16.msra.mxu0 %v573_v11  ;;  %628 = vmatprep.subr.bf16.mxu1 %v627_v37  ;;  %v345_v11 = vld [vmem:[#allocation2 + $0x20] sm:$0xff]  ;;  %v366_v37 = vld [vmem:[#allocation2 + $0xc8] sm:$0xff]  ;;  %v669_v39 = vpack.c.bf16 %v363_v36, %v361_v35  ;;  %v395_v20 = vld [vmem:[#allocation2 + $0x1b0] sm:$0xff] }
  0x4c   :  { %576 = vmatprep.subr.bf16.mxu0 %v575_v14  ;;  %v352_v14 = vld [vmem:[#allocation2 + $0x58] sm:$0xff]  ;;  %v653_v15 = vpack.c.bf16 %v347_v12, %v345_v11  ;;  %v693_v11 = vpack.c.bf16 %v387_v8, %v385_v7  ;;  %v256_v47 = vld [vmem:[%s1242_s4] sm:$0x3]  ;;  %s774_s4 = smov [#allocation5]  }
  0x4d   :  { %v655_v16 = vpack.c.bf16 %v352_v14, %v350_v13  ;;  %v389_v13 = vld [vmem:[#allocation2 + $0x180] sm:$0xff]  ;;  %v391_v14 = vld [vmem:[#allocation2 + $0x190] sm:$0xff]  ;;  %s508_s11 = sshll.u32 %s774_s4, 4  ;;  %s509_s11 = int_to_ptr.vmem [resolvable:$true] %s508_s11 }
  0x4e   :  { %630 = vmatpush1.bf16.msra.mxu1 %v629_v43  ;;  %v370_v43 = vld [vmem:[#allocation2 + $0xe8] sm:$0xff]  ;;  %v697_v17 = vpack.c.bf16 %v391_v14, %v389_v13  ;;  %p750_p9 = scmp.lt.s32.totalorder %s509_s11, %s509_s11 }
  0x4f   :  { %578 = vmatpush1.bf16.msra.mxu0 %v577_v23  ;;  %632 = vmatprep.subr.bf16.mxu1 %v631_v44  ;;  %v353_v23 = vld [vmem:[#allocation2 + $0x60] sm:$0xff]  ;;  %v372_v44 = vld [vmem:[#allocation2 + $0xf8] sm:$0xff] }
  0x50   :  { %580 = vmatprep.subr.bf16.mxu0 %v579_v26  ;;  %v360_v26 = vld [vmem:[#allocation2 + $0x98] sm:$0xff]  ;;  %v661_v27 = vpack.c.bf16 %v355_v24, %v353_v23  ;;  %v675_v46 = vpack.c.bf16 %v372_v44, %v370_v43  ;;  %v701_v23 = vpack.c.bf16 %v395_v20, %v393_v19  ;;  %v707_v43 = vpack.c.bf16 %v404_v42, %v402_v41  ;;  %v401_v44 = vld [vmem:[#allocation2 + $0x1e0] sm:$0xff] }
  0x51   :  { %v663_v28 = vpack.c.bf16 %v360_v26, %v358_v25  ;;  %v109_v25 = vlaneseq }
  0x52   :  { %634 = vmatpush1.bf16.msra.mxu1 %v633_v49  ;;  %v374_v49 = vld [vmem:[#allocation2 + $0x108] sm:$0xff] }
  0x53   :  { %582 = vmatpush1.bf16.msra.mxu0 %v581_v33  ;;  %636 = vmatprep.subr.bf16.mxu1 %v635_v50  ;;  %v665_v33 = vpack.c.bf16 %v359_v30, %v357_v29  ;;  %v376_v50 = vld [vmem:[#allocation2 + $0x118] sm:$0xff]  ;;  %v110_v26 = vshrl.u32 %v109_v25, 7 }
  0x54   :  { %648 = vmatprep.subr.bf16.mxu0 %v647_v5  ;;  %v679_v52 = vpack.c.bf16 %v376_v50, %v374_v49 }
  0x55   :  { %v115_v29 = vsub.s32 1, %v110_v26 }
  0x56   :  { %184 = vmatmul.mubr.f32.vlgmr.msra.gmra.mrb[0].mxu0 %v41_v40  ;;  %638 = vmatpush1.bf16.msra.mxu1 %v637_v55  ;;  %v671_v40 = vpack.c.bf16 %v368_v38, %v366_v37  ;;  %v378_v55 = vld [vmem:[#allocation2 + $0x128] sm:$0xff]  ;;  %v397_v38 = vld [vmem:[#allocation2 + $0x1c0] sm:$0xff] }
  0x57   :  { %640 = vmatprep.subr.bf16.mxu1 %v639_v56  ;;  %650 = vmatpush1.bf16.msra.mxu0 %v649_v9  ;;  %v380_v56 = vld [vmem:[#allocation2 + $0x138] sm:$0xff]  ;;  %v390_v9 = vld [vmem:[#allocation2 + $0x188] sm:$0xff]  ;;  %v265_v49 = vrot.slane %v256_v47, %v115_v29 }
  0x58   :  { %652 = vmatprep.subr.bf16.mxu0 %v651_v10  ;;  %v683_v58 = vpack.c.bf16 %v380_v56, %v378_v55  ;;  %v392_v10 = vld [vmem:[#allocation2 + $0x198] sm:$0xff]  ;;  %v405_v56 = vld [vmem:[%s1244_s6] sm:$0x3]  ;;  %s745_s6 = scalar_lea.vmem %s509_s11, 256 }
  0x59   :  { %v695_v12 = vpack.c.bf16 %v392_v10, %v390_v9  ;;  %p746_p8 = scmp.ne.s32.totalorder %s509_s11, %s745_s6  ;;  %p751_p10 = scmp.lt.s32.totalorder %s745_s6, %s745_s6 }
  0x5a   :  { %642 = vmatpush1.bf16.msra.mxu1 %v641_v59  ;;  %v377_v59 = vld [vmem:[#allocation2 + $0x120] sm:$0xff] }
  0x5b   :  { %644 = vmatprep.subr.bf16.mxu1 %v643_v62  ;;  %654 = vmatpush1.bf16.msra.mxu0 %v653_v15  ;;  %v384_v62 = vld [vmem:[#allocation2 + $0x158] sm:$0xff]  ;;  %v685_v63 = vpack.c.bf16 %v379_v60, %v377_v59  ;;  %v394_v15 = vld [vmem:[#allocation2 + $0x1a8] sm:$0xff]  ;;  %p752_p11 = por %p751_p10, %p750_p9 }
  0x5c   :  { %656 = vmatprep.subr.bf16.mxu0 %v655_v16  ;;  %v687_v0 = vpack.c.bf16 %v384_v62, %v382_v61  ;;  %v396_v16 = vld [vmem:[#allocation2 + $0x1b8] sm:$0xff] }
  0x5d   :  { %v699_v18 = vpack.c.bf16 %v396_v16, %v394_v15  ;;  %p753_p12 = pnand %p752_p11, %p746_p8 }
  0x5e   :  { %646 = vmatpush1.bf16.msra.mxu1 %v645_v1  ;;  %v381_v1 = vld [vmem:[#allocation2 + $0x140] sm:$0xff] }
  0x5f   :  { %658 = vmatpush1.bf16.msra.mxu0 %v657_v21  ;;  %v689_v5 = vpack.c.bf16 %v383_v2, %v381_v1  ;;  %v398_v21 = vld [vmem:[#allocation2 + $0x1c8] sm:$0xff] }
  0x60   :  { %660 = vmatprep.subr.bf16.mxu0 %v659_v22  ;;  %v400_v22 = vld [vmem:[#allocation2 + $0x1d8] sm:$0xff] }
  0x61   :  { %v703_v24 = vpack.c.bf16 %v400_v22, %v398_v21 }
  0x63   :  { %662 = vmatpush1.bf16.msra.mxu0 %v661_v27  ;;  %v111_v27 = vsub.s32 0, %v110_v26 }
  0x64   :  { %664 = vmatprep.subr.bf16.mxu0 %v663_v28  ;;  %v107_v28 = vld [vmem:[%s1240_s2] sm:$0x3] }
  0x65   :  { %v112_v30 = vrot.slane %v107_v28, %v111_v27  ;;  %v116_v31 = vrot.slane %v107_v28, %v115_v29  ;;  %v261_v48 = vrot.slane %v256_v47, %v111_v27 }
  0x67   :  { %666 = vmatpush1.bf16.msra.mxu0 %v665_v33 }
  0x68   :  { %668 = vmatprep.subr.bf16.mxu0 %v667_v34 }
  0x6b   :  { %670 = vmatpush1.bf16.msra.mxu0 %v669_v39  ;;  %v399_v39 = vld [vmem:[#allocation2 + $0x1d0] sm:$0xff] }
  0x6c   :  { %672 = vmatprep.subr.bf16.mxu0 %v671_v40  ;;  %v705_v40 = vpack.c.bf16 %v399_v39, %v397_v38 }
  0x6f   :  { %674 = vmatpush1.bf16.msra.mxu0 %v673_v45  ;;  %v403_v45 = vld [vmem:[#allocation2 + $0x1f0] sm:$0xff] }
  0x70   :  { %676 = vmatprep.subr.bf16.mxu0 %v675_v46  ;;  %v709_v46 = vpack.c.bf16 %v403_v45, %v401_v44 }
  0x73   :  { %678 = vmatpush1.bf16.msra.mxu0 %v677_v51 }
  0x74   :  { %680 = vmatprep.subr.bf16.mxu0 %v679_v52 }
  0x77   :  { %682 = vmatpush1.bf16.msra.mxu0 %v681_v57  ;;  %v410_v57 = vrot.slane %v405_v56, %v111_v27 }
  0x78   :  { %684 = vmatprep.subr.bf16.mxu0 %v683_v58  ;;  %v414_v58 = vrot.slane %v405_v56, %v115_v29 }
  0x7b   :  { %686 = vmatpush1.bf16.msra.mxu0 %v685_v63 }
  0x7c   :  { %688 = vmatprep.subr.bf16.mxu0 %v687_v0 }
  0x7f   :  { %690 = vmatpush1.bf16.msra.mxu0 %v689_v5 }
  0x80   :  { %692 = vmatprep.subr.bf16.mxu0 %v691_v6 }
  0x83   :  { %694 = vmatpush1.bf16.msra.mxu0 %v693_v11 }
  0x84   :  { %696 = vmatprep.subr.bf16.mxu0 %v695_v12 }
  0x87   :  { %698 = vmatpush1.bf16.msra.mxu0 %v697_v17 }
  0x88   :  { %700 = vmatprep.subr.bf16.mxu0 %v699_v18 }
  0x8b   :  { %702 = vmatpush1.bf16.msra.mxu0 %v701_v23 }
  0x8c   :  { %704 = vmatprep.subr.bf16.mxu0 %v703_v24 }
  0x8f   :  { %706 = vmatpush1.bf16.msra.mxu0 %v705_v40 }
  0x90   :  { %708 = vmatprep.subr.bf16.mxu0 %v707_v43 }
  0x93   :  { %710 = vmatpush1.bf16.msra.mxu0 %v709_v46 }
 0x129   :  { %v185_v32 = vpop.f32.mrb[0].mxu0 }
 0x12a   :  { %v186_v33 = vadd.f32 %v185_v32, %v112_v30  ;;  %v187_v34 = vpop.f32.mrb[1].mxu0 }
 0x12b   :  { %v188_v35 = vadd.f32 %v187_v34, %v116_v31 }
 0x12c   :  { %v190_v37 = vmax.f32 %v186_v33, 0.0 }
 0x12d   :  { %v191_v36 = vmax.f32 %v188_v35, 0.0 }
 0x12f   :  { %332 = vmatprep.mubr.f32.mxu1 %v191_v36 }
 0x130   :  { %333 = vmatmul.mubr.f32.vlgmr.msra.gmra.mrb[0].mxu1 %v190_v37 }
 0x203   :  { %v334_v50 = vpop.f32.mrb[0].mxu1 }
 0x204   :  { %v335_v51 = vadd.f32 %v334_v50, %v261_v48  ;;  %v336_v52 = vpop.f32.mrb[1].mxu1 }
 0x205   :  { %v337_v53 = vadd.f32 %v336_v52, %v265_v49 }
 0x206   :  { %v339_v55 = vmax.f32 %v335_v51, 0.0 }
 0x207   :  { %v340_v54 = vmax.f32 %v337_v53, 0.0 }
 0x209   :  { %481 = vmatprep.mubr.f32.mxu0 %v340_v54 }
 0x20a   :  { %482 = vmatmul.mubr.f32.vlgmr.msra.gmra.mrb[2].mxu0 %v339_v55 }
 0x2dd   :  { %v483_v59 = vpop.f32.mrb[2].mxu0 }
 0x2de   :  { %v484_v60 = vadd.f32 %v483_v59, %v410_v57  ;;  %v485_v61 = vpop.f32.mrb[3].mxu0 }
 0x2df   :  { %v486_v62 = vadd.f32 %v485_v61, %v414_v58 }
 0x2e0   :  { %v517_v63 = vmul.f32 -1.442695, %v484_v60 }
 0x2e1   :  { %v518_v0 = vmul.f32 -1.442695, %v486_v62 }
 0x2e2   :  { %715 = vpow2.f32 %v517_v63 }
 0x2e3   :  { %717 = vpow2.f32 %v518_v0 }
 0x2ec   :  { %v716_v1 = vpop.eup %715 }
 0x2ed   :  { %v718_v2 = vpop.eup %717  ;;  %v494_v3 = vadd.f32 1.0, %v716_v1 }
 0x2ee   :  { %v495_v4 = vadd.f32 1.0, %v718_v2 }
 0x2ef   :  { %719 = vrcp.f32 %v494_v3 }
 0x2f0   :  { %721 = vrcp.f32 %v495_v4 }
 0x2f9   :  { %v720_v5 = vpop.eup %719 }
 0x2fa   :  { %v722_v6 = vpop.eup %721  ;;  %500 = vst [vmem:[#allocation5] sm:$0xff] %v720_v5 }
 0x2fb   :  { %501 = vst [vmem:[#allocation5 + $0x8] sm:$0xff] %v722_v6 }
 0x2fc   :  { %756 = shalt.err (!%p753_p12)
}
 0x2fd   :  { %s757_s14 = scalar_lea.hbm %s1245_s7, 256 }
 0x2fe   :  { %p758_p13 = scmp.ne.s32.totalorder %s1245_s7, %s757_s14  ;;  %p761_p0 = scmp.lt.u32.totalorder %s757_s14, %s1245_s7 }
 0x300   :  { %p763_p1 = pnand %p761_p0, %p758_p13 }
 0x302   :  { %766 = shalt.err (!%p763_p1)
}
 0x303   :  { %511 = dma.vmem_to_hbm [thread:$0]  %s509_s11, 256, %s1245_s7, [#allocation4]  }
 0x304   :  { %769 = dma.done.wait [#allocation4], 256  }
 0x305   :  { %770 = vsyncadd [#allocation4], 4294967040 }
 0x306   :  { %515 = vsyncpa [#allocation3], 1 }
 0x307   :  { %516 = vsyncpa [#allocation4], 1 }

</bundles_post_ra>
